<compile_context>
chip_gen: v7x
topology: tpu7x:2x2x1
jax: 0.10.0
libtpu: 0.0.40
codegen_flags: <defaults>
</compile_context>

<pallas_src>
import functools

import jax
import jax.numpy as jnp
from jax.experimental import pallas as pl
from jax.experimental.pallas import tpu as pltpu

P_DROP = 0.1
SCALE = 1.0 / (1.0 - P_DROP)
# keep element  <=>  uniform >= p  <=>  raw_bits >= p * 2^32   (unsigned compare)
KEEP_THRESHOLD_INT = int(P_DROP * (1 << 32))


def model_kernel(x_ref, mask_ref, wt_ref, b_ref, bits_ref, out_ref):
    x = x_ref[...]          # (N, F_in)  f32
    mask = mask_ref[...]    # (N, F_in)  f32
    bits = bits_ref[...]    # (2, N, F_in) uint32  (both dropout draws, one array)

    threshold = jnp.uint32(KEEP_THRESHOLD_INT)
    scale = jnp.float32(SCALE)
    zero = jnp.float32(0.0)

    # --- dropout #1 on mask: threshold-compare raw bits, fused keep*scale ---
    keep1 = bits[0] >= threshold
    o_mask = mask * jnp.where(keep1, scale, zero)

    xm = x * o_mask

    # --- lin1: tiny matmul as an unrolled VPU contraction (K = F_in = 5) ---
    k_dim = wt_ref.shape[0]
    y = xm[:, 0:1] * wt_ref[0:1, :]
    for k in range(1, k_dim):                      # static unroll at trace time
        y = y + xm[:, k:k + 1] * wt_ref[k:k + 1, :]
    y = y + b_ref[...]                             # (1, F_out) broadcast

    # --- dropout #2 applied to o_mask (reuses the already-formed o_mask) ---
    keep2 = bits[1] >= threshold
    o_mask2 = o_mask * jnp.where(keep2, scale, zero)

    out_ref[...] = y * o_mask2


@jax.jit
def model_forward(x, mask, w, b, key):
    """x:(N,F_in), mask:(N,F_in), w:(F_out,F_in) PyTorch layout, b:(F_out,), key: PRNG key."""
    x = x.astype(jnp.float32)
    mask = mask.astype(jnp.float32)
    wt = w.astype(jnp.float32).T                   # (F_in, F_out), fused under jit
    b2 = b.astype(jnp.float32).reshape(1, -1)      # (1, F_out)

    n, f_in = x.shape
    f_out = wt.shape[1]

    # One PRNG draw covering both dropout masks.
    bits = jax.random.bits(key, (2, n, f_in), dtype=jnp.uint32)

    return pl.pallas_call(
        model_kernel,
        out_shape=jax.ShapeDtypeStruct((n, f_out), jnp.float32),
        in_specs=[
            pl.BlockSpec(memory_space=pltpu.MemorySpace.VMEM),   # x
            pl.BlockSpec(memory_space=pltpu.MemorySpace.VMEM),   # mask
            pl.BlockSpec(memory_space=pltpu.MemorySpace.VMEM),   # W^T
            pl.BlockSpec(memory_space=pltpu.MemorySpace.VMEM),   # bias (1, F_out)
            pl.BlockSpec(memory_space=pltpu.MemorySpace.VMEM),   # random bits
        ],
        out_specs=pl.BlockSpec(memory_space=pltpu.MemorySpace.VMEM),
    )(x, mask, wt, b2, bits)


if __name__ == "__main__":
    key = jax.random.PRNGKey(0)
    kx, kw, kb, kd = jax.random.split(key, 4)

    N, F = 10, 5                                   # shapes implied by torch.randn(10, 5)
    x = jax.random.normal(kx, (N, F), dtype=jnp.float32)
    mask = jnp.ones((N, F), dtype=jnp.float32)

    # Deterministic nn.Linear(5, 5)-style init: U(-1/sqrt(F), 1/sqrt(F))
    bound = 1.0 / float(F) ** 0.5
    w = jax.random.uniform(kw, (F, F), minval=-bound, maxval=bound, dtype=jnp.float32)
    b = jax.random.uniform(kb, (F,), minval=-bound, maxval=bound, dtype=jnp.float32)

    out = model_forward(x, mask, w, b, kd)
    jax.block_until_ready(out)
    assert out.shape == (N, F) and out.dtype == jnp.float32
    print("KERNEL_OK")
</pallas_src>

<mosaic_0001>
module attributes {stable_mosaic.version = 11 : i64} {
  func.func @model_kernel(%arg0: memref<10x5xf32, #tpu.memory_space<vmem>>, %arg1: memref<10x5xf32, #tpu.memory_space<vmem>>, %arg2: memref<5x5xf32, #tpu.memory_space<vmem>>, %arg3: memref<1x5xf32, #tpu.memory_space<vmem>>, %arg4: memref<2x10x5xi32, #tpu.memory_space<vmem>>, %arg5: memref<10x5xf32, #tpu.memory_space<vmem>>) attributes {dimension_semantics = [], scalar_prefetch = 0 : i64, scratch_operands = 0 : i64, tpu.core_type = #tpu.core_type<tc>} {
    %c0 = arith.constant 0 : index
    %c0_0 = arith.constant 0 : index
    %0 = vector.load %arg0[%c0, %c0_0] : memref<10x5xf32, #tpu.memory_space<vmem>>, vector<10x5xf32>
    %c0_1 = arith.constant 0 : index
    %c0_2 = arith.constant 0 : index
    %1 = vector.load %arg1[%c0_1, %c0_2] : memref<10x5xf32, #tpu.memory_space<vmem>>, vector<10x5xf32>
    %c0_3 = arith.constant 0 : index
    %c0_4 = arith.constant 0 : index
    %c0_5 = arith.constant 0 : index
    %2 = vector.load %arg4[%c0_3, %c0_4, %c0_5] : memref<2x10x5xi32, #tpu.memory_space<vmem>>, vector<2x10x5xi32>
    %3 = vector.extract_strided_slice %2 {offsets = [0, 0, 0], sizes = [1, 10, 5], strides = [1, 1, 1]} : vector<2x10x5xi32> to vector<1x10x5xi32>
    %4 = vector.shape_cast %3 : vector<1x10x5xi32> to vector<10x5xi32>
    %c429496729_i32 = arith.constant 429496729 : i32
    %5 = vector.broadcast %c429496729_i32 : i32 to vector<10x5xi32>
    %6 = arith.cmpi uge, %4, %5 : vector<10x5xi32>
    %cst = arith.constant 1.11111116 : f32
    %cst_6 = arith.constant 0.000000e+00 : f32
    %7 = vector.broadcast %cst : f32 to vector<10x5xf32>
    %8 = vector.broadcast %cst_6 : f32 to vector<10x5xf32>
    %9 = arith.select %6, %7, %8 : vector<10x5xi1>, vector<10x5xf32>
    %10 = arith.mulf %1, %9 : vector<10x5xf32>
    %11 = arith.mulf %0, %10 : vector<10x5xf32>
    %12 = vector.extract_strided_slice %11 {offsets = [0, 0], sizes = [10, 1], strides = [1, 1]} : vector<10x5xf32> to vector<10x1xf32>
    %c0_7 = arith.constant 0 : index
    %c0_8 = arith.constant 0 : index
    %13 = vector.load %arg2[%c0_7, %c0_8] : memref<5x5xf32, #tpu.memory_space<vmem>>, vector<1x5xf32>
    %14 = vector.broadcast %12 : vector<10x1xf32> to vector<10x5xf32>
    %15 = vector.broadcast %13 : vector<1x5xf32> to vector<10x5xf32>
    %16 = arith.mulf %14, %15 : vector<10x5xf32>
    %17 = vector.extract_strided_slice %11 {offsets = [0, 1], sizes = [10, 1], strides = [1, 1]} : vector<10x5xf32> to vector<10x1xf32>
    %c1 = arith.constant 1 : index
    %c0_9 = arith.constant 0 : index
    %18 = vector.load %arg2[%c1, %c0_9] : memref<5x5xf32, #tpu.memory_space<vmem>>, vector<1x5xf32>
    %19 = vector.broadcast %17 : vector<10x1xf32> to vector<10x5xf32>
    %20 = vector.broadcast %18 : vector<1x5xf32> to vector<10x5xf32>
    %21 = arith.mulf %19, %20 : vector<10x5xf32>
    %22 = arith.addf %16, %21 : vector<10x5xf32>
    %23 = vector.extract_strided_slice %11 {offsets = [0, 2], sizes = [10, 1], strides = [1, 1]} : vector<10x5xf32> to vector<10x1xf32>
    %c2 = arith.constant 2 : index
    %c0_10 = arith.constant 0 : index
    %24 = vector.load %arg2[%c2, %c0_10] : memref<5x5xf32, #tpu.memory_space<vmem>>, vector<1x5xf32>
    %25 = vector.broadcast %23 : vector<10x1xf32> to vector<10x5xf32>
    %26 = vector.broadcast %24 : vector<1x5xf32> to vector<10x5xf32>
    %27 = arith.mulf %25, %26 : vector<10x5xf32>
    %28 = arith.addf %22, %27 : vector<10x5xf32>
    %29 = vector.extract_strided_slice %11 {offsets = [0, 3], sizes = [10, 1], strides = [1, 1]} : vector<10x5xf32> to vector<10x1xf32>
    %c3 = arith.constant 3 : index
    %c0_11 = arith.constant 0 : index
    %30 = vector.load %arg2[%c3, %c0_11] : memref<5x5xf32, #tpu.memory_space<vmem>>, vector<1x5xf32>
    %31 = vector.broadcast %29 : vector<10x1xf32> to vector<10x5xf32>
    %32 = vector.broadcast %30 : vector<1x5xf32> to vector<10x5xf32>
    %33 = arith.mulf %31, %32 : vector<10x5xf32>
    %34 = arith.addf %28, %33 : vector<10x5xf32>
    %35 = vector.extract_strided_slice %11 {offsets = [0, 4], sizes = [10, 1], strides = [1, 1]} : vector<10x5xf32> to vector<10x1xf32>
    %c4 = arith.constant 4 : index
    %c0_12 = arith.constant 0 : index
    %36 = vector.load %arg2[%c4, %c0_12] : memref<5x5xf32, #tpu.memory_space<vmem>>, vector<1x5xf32>
    %37 = vector.broadcast %35 : vector<10x1xf32> to vector<10x5xf32>
    %38 = vector.broadcast %36 : vector<1x5xf32> to vector<10x5xf32>
    %39 = arith.mulf %37, %38 : vector<10x5xf32>
    %40 = arith.addf %34, %39 : vector<10x5xf32>
    %c0_13 = arith.constant 0 : index
    %c0_14 = arith.constant 0 : index
    %41 = vector.load %arg3[%c0_13, %c0_14] : memref<1x5xf32, #tpu.memory_space<vmem>>, vector<1x5xf32>
    %42 = vector.broadcast %41 : vector<1x5xf32> to vector<10x5xf32>
    %43 = arith.addf %40, %42 : vector<10x5xf32>
    %44 = vector.extract_strided_slice %2 {offsets = [1, 0, 0], sizes = [1, 10, 5], strides = [1, 1, 1]} : vector<2x10x5xi32> to vector<1x10x5xi32>
    %45 = vector.shape_cast %44 : vector<1x10x5xi32> to vector<10x5xi32>
    %c429496729_i32_15 = arith.constant 429496729 : i32
    %46 = vector.broadcast %c429496729_i32_15 : i32 to vector<10x5xi32>
    %47 = arith.cmpi uge, %45, %46 : vector<10x5xi32>
    %cst_16 = arith.constant 1.11111116 : f32
    %cst_17 = arith.constant 0.000000e+00 : f32
    %48 = vector.broadcast %cst_16 : f32 to vector<10x5xf32>
    %49 = vector.broadcast %cst_17 : f32 to vector<10x5xf32>
    %50 = arith.select %47, %48, %49 : vector<10x5xi1>, vector<10x5xf32>
    %51 = arith.mulf %10, %50 : vector<10x5xf32>
    %52 = arith.mulf %43, %51 : vector<10x5xf32>
    %c0_18 = arith.constant 0 : index
    %c0_19 = arith.constant 0 : index
    %53 = vector.load %arg5[%c0_18, %c0_19] : memref<10x5xf32, #tpu.memory_space<vmem>>, vector<10x5xf32>
    tpu.vector_store %arg5[%c0_18, %c0_19], %52 {strides = array<i32>} : memref<10x5xf32, #tpu.memory_space<vmem>>, vector<10x5xf32>,
    return
  }
}

</mosaic_0001>

<bundles_post_ra>
// kernel: model_forward.1
= control target key start
LH: loop header
LB: loop body
LE: loop exit
PB: predicated region body
PF: predicated region fallthrough
CT: control target
= control target key end

     0   :  { %v166_v0 = vmov 1   ;;  %v167_v1 = vmov 0   ;;  %v168_v5 = vmov 0.0   ;;  %v169_v15 = vmov 2   ;;  %s250_s0 = inlined_call_operand.vmem [shape: f32[10,5], index: 0, kind: input, shape index: {}]   ;;  %s251_s1 = inlined_call_operand.vmem [shape: f32[10,5], index: 1, kind: input, shape index: {}]   ;;  %s252_s4 = inlined_call_operand.vmem [shape: u32[2,10,5], index: 4, kind: input, shape index: {}]   ;;  %s253_s2 = inlined_call_operand.vmem [shape: f32[5,5], index: 2, kind: input, shape index: {}]   ;;  %s254_s3 = inlined_call_operand.vmem [shape: f32[1,5], index: 3, kind: input, shape index: {}]   ;;  %s255_s5 = inlined_call_operand.vmem [shape: f32[10,5], index: 5, kind: output, shape index: {}]  }
   0x1   :  { %159 = vset.pattern.permute.xlu1 %v166_v0  ;;  %158 = vset.pattern.permute.xlu0 %v167_v1  ;;  %v22_v2 = vld [vmem:[%s251_s1] sm:$0xff]  ;;  %v23_v7 = vld [vmem:[%s251_s1 + $0x8] sm:$0x3]  ;;  %v170_v16 = vmov 3   ;;  %v26_v17 = vld [vmem:[%s252_s4 + $0x10] sm:$0xff]  ;;  %v171_v18 = vmov 4  }
   0x2   :  { %v24_v3 = vld [vmem:[%s252_s4] sm:$0xff]  ;;  %v25_v8 = vld [vmem:[%s252_s4 + $0x8] sm:$0x3]  ;;  %vm130_vm2 = vcmp.ge.u32.totalorder %v26_v17, 429496729  ;;  %vm138_vm4 = vcmask 39936  }
   0x3   :  { %v20_v4 = vld [vmem:[%s250_s0] sm:$0xff]  ;;  %vm28_vm0 = vcmp.ge.u32.totalorder %v24_v3, 429496729  ;;  %vm29_vm1 = vcmp.ge.u32.totalorder %v25_v8, 429496729  ;;  %vm140_vm5 = vcmask 33792  }
   0x4   :  { %v30_v6 = vsel %vm28_vm0, 1.1111112, %v168_v5  ;;  %v21_v10 = vld [vmem:[%s250_s0 + $0x8] sm:$0x3]  ;;  %v31_v11 = vsel %vm29_vm1, 1.1111112, %v168_v5 }
   0x5   :  { %v32_v9 = vmul.f32 %v30_v6, %v22_v2  ;;  %v33_v13 = vmul.f32 %v31_v11, %v23_v7  ;;  %v132_v19 = vsel %vm130_vm2, 1.1111112, %v168_v5  ;;  %v27_v21 = vld [vmem:[%s252_s4 + $0x18] sm:$0x3]  ;;  %v147_v28 = vld [vmem:[%s253_s2 + $0x1] ss:$0 sm:$0xff] }
   0x6   :  { %vm131_vm3 = vcmp.ge.u32.totalorder %v27_v21, 429496729  ;;  %v146_v29 = vld [vmem:[%s253_s2] ss:$0 sm:$0xff]  ;;  %v148_v31 = vld [vmem:[%s253_s2 + $0x2] ss:$0 sm:$0xff] }
   0x7   :  { %v34_v12 = vmul.f32 %v32_v9, %v20_v4  ;;  %v35_v14 = vmul.f32 %v33_v13, %v21_v10  ;;  %v134_v20 = vmul.f32 %v132_v19, %v32_v9  ;;  %v133_v22 = vsel %vm131_vm3, 1.1111112, %v168_v5  ;;  %v149_v35 = vld [vmem:[%s253_s2 + $0x3] ss:$0 sm:$0xff]  ;;  %v150_v43 = vld [vmem:[%s253_s2 + $0x4] ss:$0 sm:$0xff] }
   0x8   :  { %v135_v23 = vmul.f32 %v133_v22, %v33_v13  ;;  %v151_v51 = vld [vmem:[%s254_s3] ss:$0 sm:$0xff] }
   0x9   :  { %55 = vperm.xlu1 %159, %v34_v12   ;;  %39 = vperm.xlu0 %158, %v34_v12  }
   0xd   :  { %59 = vperm.xlu1 %159, %v35_v14   ;;  %44 = vperm.xlu0 %158, %v35_v14  }
  0x11   :  { %161 = vset.pattern.permute.xlu1 %v169_v15  ;;  %160 = vset.pattern.permute.xlu0 %v169_v15 }
  0x12   :  { %76 = vperm.xlu1 %161, %v35_v14   ;;  %72 = vperm.xlu0 %160, %v34_v12  }
  0x16   :  { %162 = vset.pattern.permute.xlu1 %v170_v16  ;;  %163 = vset.pattern.permute.xlu0 %v170_v16 }
  0x17   :  { %89 = vperm.xlu1 %162, %v34_v12   ;;  %93 = vperm.xlu0 %163, %v35_v14  }
  0x1b   :  { %164 = vset.pattern.permute.xlu1 %v171_v18  ;;  %165 = vset.pattern.permute.xlu0 %v171_v18 }
  0x1c   :  { %106 = vperm.xlu1 %164, %v34_v12  }
  0x20   :  { %110 = vperm.xlu1 %164, %v35_v14  }
  0x88   :  { %v56_v24 = vpop.permute.xlu1 %55  ;;  %v40_v25 = vpop.permute.xlu0 %39 }
  0x89   :  { %v66_v33 = vmul.f32 %v147_v28, %v56_v24  ;;  %v51_v34 = vmul.f32 %v146_v29, %v40_v25 }
  0x8b   :  { %v68_v38 = vadd.f32 %v66_v33, %v51_v34 }
  0x8c   :  { %v60_v26 = vpop.permute.xlu1 %59  ;;  %v45_v27 = vpop.permute.xlu0 %44 }
  0x8d   :  { %v67_v39 = vmul.f32 %v147_v28, %v60_v26  ;;  %v52_v40 = vmul.f32 %v146_v29, %v45_v27 }
  0x8f   :  { %v69_v47 = vadd.f32 %v67_v39, %v52_v40 }
  0x91   :  { %v77_v30 = vpop.permute.xlu1 %76  ;;  %v73_v32 = vpop.permute.xlu0 %72 }
  0x92   :  { %v83_v36 = vmul.f32 %v148_v31, %v73_v32  ;;  %v84_v44 = vmul.f32 %v148_v31, %v77_v30 }
  0x94   :  { %v85_v45 = vadd.f32 %v83_v36, %v68_v38  ;;  %v86_v52 = vadd.f32 %v84_v44, %v69_v47 }
  0x96   :  { %v90_v37 = vpop.permute.xlu1 %89  ;;  %v94_v42 = vpop.permute.xlu0 %93 }
  0x97   :  { %v100_v41 = vmul.f32 %v149_v35, %v90_v37  ;;  %v101_v49 = vmul.f32 %v149_v35, %v94_v42 }
  0x99   :  { %v102_v48 = vadd.f32 %v100_v41, %v85_v45  ;;  %v103_v55 = vadd.f32 %v101_v49, %v86_v52 }
  0x9b   :  { %v107_v46 = vpop.permute.xlu1 %106 }
  0x9c   :  { %v117_v50 = vmul.f32 %v150_v43, %v107_v46 }
  0x9e   :  { %v119_v53 = vadd.f32 %v117_v50, %v102_v48 }
  0x9f   :  { %v111_v54 = vpop.permute.xlu1 %110 }
  0xa0   :  { %v128_v56 = vadd.f32 %v151_v51, %v119_v53  ;;  %v118_v57 = vmul.f32 %v150_v43, %v111_v54 }
  0xa2   :  { %v136_v58 = vmul.f32 %v134_v20, %v128_v56  ;;  %v120_v59 = vadd.f32 %v118_v57, %v103_v55 }
  0xa4   :  { %139 = vst.msk [vmem:[%s255_s5] sm:$0xff] %vm138_vm4, %v136_v58  ;;  %v129_v60 = vadd.f32 %v151_v51, %v120_v59 }
  0xa6   :  { %v137_v61 = vmul.f32 %v135_v23, %v129_v60 }
  0xa8   :  { %141 = vst.msk [vmem:[%s255_s5 + $0x8] sm:$0x3] %vm140_vm5, %v137_v61 }

</bundles_post_ra>
